<compile_context>
chip_gen: v6e
topology: v6e:2x2x1
jax: 0.10.0
libtpu: 0.0.40
codegen_flags: <defaults>
</compile_context>

<pallas_src>
import functools

import jax
import jax.numpy as jnp
from jax import lax
from jax.experimental import pallas as pl
from jax.experimental.pallas import tpu as pltpu

EPS = 1e-5                       # nn.BatchNorm1d default
_LANE = 128
_SUBLANE = 8
# Working-set budget for the fully fused (single-block) path, conservative
# against the smallest default scoped VMEM across generations (16 MiB on v5e).
_FUSED_VMEM_BUDGET = 12 * 1024 * 1024
_TILE_VMEM_BUDGET = 12 * 1024 * 1024
# Explicit Mosaic scoped-VMEM limit; leaves headroom below v7x's 64 MiB/core.
_VMEM_LIMIT_BYTES = 48 * 1024 * 1024


def _round_up(v, m):
    return (v + m - 1) // m * m


# ----------------------------------------------------------------------------
# In-kernel helpers
# ----------------------------------------------------------------------------
def _edge_masks(M, L):
    """0/1 float masks (M,1): zero at the first / last position of each length-L
    segment.  Computed once per kernel invocation and reused by both convs."""
    l_idx = lax.broadcasted_iota(jnp.int32, (M, 1), 0) % L
    not_first = (l_idx != 0).astype(jnp.float32)
    not_last = (l_idx != (L - 1)).astype(jnp.float32)
    return not_first, not_last


def _conv3(y, wcat, not_first, not_last, mxu_dtype):
    """k=3, pad=1 Conv1d as a single fused (M,3Cp)@(3Cp,Cp) MXU matmul."""
    M = y.shape[0]
    prev = pltpu.roll(y, shift=1, axis=0) * not_first        # x[l-1], 0 at l==0
    nxt = pltpu.roll(y, shift=M - 1, axis=0) * not_last      # x[l+1], 0 at l==L-1
    yc = jnp.concatenate([prev, y, nxt], axis=1).astype(mxu_dtype)
    return jnp.dot(yc, wcat, preferred_element_type=jnp.float32)


# ----------------------------------------------------------------------------
# Fully fused kernel (whole slab resident in VMEM) — used when it fits.
# ----------------------------------------------------------------------------
def _resblock_fused_kernel(x_ref, w1_ref, w2_ref, g1_ref, b1_ref, g2_ref,
                           b2_ref, o_ref, *, L, mxu_dtype):
    x = x_ref[...]                                   # (M, Cp) f32
    M = x.shape[0]
    not_first, not_last = _edge_masks(M, L)          # hoisted, reused twice
    inv_m = jnp.float32(1.0 / M)

    def bn(y, g_ref, b_ref):
        # One-pass biased batch statistics: var = E[y^2] - E[y]^2.
        s = jnp.sum(y, axis=0, keepdims=True)
        ss = jnp.sum(y * y, axis=0, keepdims=True)
        mean = s * inv_m
        var = jnp.maximum(ss * inv_m - mean * mean, 0.0)
        return (y - mean) * lax.rsqrt(var + EPS) * g_ref[...] + b_ref[...]

    h = _conv3(x, w1_ref[...], not_first, not_last, mxu_dtype)
    h = jnp.maximum(bn(h, g1_ref, b1_ref), 0.0)
    h = _conv3(h, w2_ref[...], not_first, not_last, mxu_dtype)
    h = bn(h, g2_ref, b2_ref)
    o_ref[...] = jnp.maximum(h + x, 0.0)


def _resblock_fused(x2d, w1cat, w2cat, g1, b1, g2, b2, *, L, mxu_dtype):
    M, Cp = x2d.shape
    vmem = pltpu.MemorySpace.VMEM
    return pl.pallas_call(
        functools.partial(_resblock_fused_kernel, L=L, mxu_dtype=mxu_dtype),
        out_shape=jax.ShapeDtypeStruct((M, Cp), jnp.float32),
        in_specs=[pl.BlockSpec(memory_space=vmem) for _ in range(7)],
        out_specs=pl.BlockSpec(memory_space=vmem),
        compiler_params=pltpu.CompilerParams(
            vmem_limit_bytes=_VMEM_LIMIT_BYTES),
    )(x2d, w1cat, w2cat, g1, b1, g2, b2)


# ----------------------------------------------------------------------------
# Tiled three-pass path (global BN stats survive tiling over batch).
# ----------------------------------------------------------------------------
def _accumulate_stats(st_ref, h):
    st = jnp.concatenate([jnp.sum(h, axis=0, keepdims=True),
                          jnp.sum(h * h, axis=0, keepdims=True)], axis=0)

    @pl.when(pl.program_id(0) == 0)
    def _():
        st_ref[...] = st

    @pl.when(pl.program_id(0) != 0)
    def _():
        st_ref[...] = st_ref[...] + st


def _conv_stats_kernel(x_ref, w_ref, h_ref, st_ref, *, L, mxu_dtype):
    x = x_ref[...]
    not_first, not_last = _edge_masks(x.shape[0], L)
    h = _conv3(x, w_ref[...], not_first, not_last, mxu_dtype)
    h_ref[...] = h
    _accumulate_stats(st_ref, h)


def _bn_relu_conv_stats_kernel(h1_ref, w_ref, sc_ref, sh_ref, h2_ref, st_ref,
                               *, L, mxu_dtype):
    y = jnp.maximum(h1_ref[...] * sc_ref[...] + sh_ref[...], 0.0)
    not_first, not_last = _edge_masks(y.shape[0], L)
    h2 = _conv3(y, w_ref[...], not_first, not_last, mxu_dtype)
    h2_ref[...] = h2
    _accumulate_stats(st_ref, h2)


def _bn_residual_relu_kernel(h2_ref, x_ref, sc_ref, sh_ref, o_ref):
    o_ref[...] = jnp.maximum(
        h2_ref[...] * sc_ref[...] + sh_ref[...] + x_ref[...], 0.0)


def _finalize_bn(stats, gamma, beta, inv_m):
    """Fold batch statistics + affine params into per-channel scale/shift."""
    mean = stats[0:1] * inv_m
    var = jnp.maximum(stats[1:2] * inv_m - mean * mean, 0.0)
    scale = gamma * lax.rsqrt(var + EPS)
    shift = beta - mean * scale
    return scale, shift


def _resblock_tiled(x2d, w1cat, w2cat, g1, b1, g2, b2, *, L, tn, Cp, mxu_dtype):
    M = x2d.shape[0]
    TM = tn * L
    num_tiles = M // TM
    inv_m = 1.0 / M

    def tile():
        return pl.BlockSpec((TM, Cp), lambda i: (i, 0))

    def keep(rows, cols):                      # constant block -> VMEM-resident
        return pl.BlockSpec((rows, cols), lambda i: (0, 0))

    arb = pltpu.CompilerParams(dimension_semantics=("arbitrary",),
                               vmem_limit_bytes=_VMEM_LIMIT_BYTES)
    par = pltpu.CompilerParams(dimension_semantics=("parallel",),
                               vmem_limit_bytes=_VMEM_LIMIT_BYTES)

    # Pass 1: h1 = conv1(x); accumulate per-channel sum / sumsq of h1.
    h1, st1 = pl.pallas_call(
        functools.partial(_conv_stats_kernel, L=L, mxu_dtype=mxu_dtype),
        grid=(num_tiles,),
        in_specs=[tile(), keep(3 * Cp, Cp)],
        out_specs=[tile(), keep(2, Cp)],
        out_shape=[jax.ShapeDtypeStruct((M, Cp), jnp.float32),
                   jax.ShapeDtypeStruct((2, Cp), jnp.float32)],
        compiler_params=arb,
    )(x2d, w1cat)
    sc1, sh1 = _finalize_bn(st1, g1, b1, inv_m)

    # Pass 2: h2 = conv2(relu(bn1(h1))); accumulate stats for bn2.
    h2, st2 = pl.pallas_call(
        functools.partial(_bn_relu_conv_stats_kernel, L=L, mxu_dtype=mxu_dtype),
        grid=(num_tiles,),
        in_specs=[tile(), keep(3 * Cp, Cp), keep(1, Cp), keep(1, Cp)],
        out_specs=[tile(), keep(2, Cp)],
        out_shape=[jax.ShapeDtypeStruct((M, Cp), jnp.float32),
                   jax.ShapeDtypeStruct((2, Cp), jnp.float32)],
        compiler_params=arb,
    )(h1, w2cat, sc1, sh1)
    sc2, sh2 = _finalize_bn(st2, g2, b2, inv_m)

    # Pass 3: out = relu(bn2(h2) + x)  (embarrassingly parallel over tiles).
    return pl.pallas_call(
        _bn_residual_relu_kernel,
        grid=(num_tiles,),
        in_specs=[tile(), tile(), keep(1, Cp), keep(1, Cp)],
        out_specs=tile(),
        out_shape=jax.ShapeDtypeStruct((M, Cp), jnp.float32),
        compiler_params=par,
    )(h2, x2d, sc2, sh2)


# ----------------------------------------------------------------------------
# Host-side wrapper
# ----------------------------------------------------------------------------
def _prep_weight(w, C, Cp, dtype):
    # (C_out, C_in, K=3) -> (3*Cp, Cp): rows = tap-major then input channel
    # (taps ordered [x[l-1], x[l], x[l+1]]), cols = output channel.
    wt = jnp.transpose(jnp.asarray(w, jnp.float32), (2, 1, 0))     # (3, Ci, Co)
    wt = jnp.pad(wt, ((0, 0), (0, Cp - C), (0, Cp - C)))
    return wt.reshape(3 * Cp, Cp).astype(dtype)


def _pad_vec(v, C, Cp):
    return jnp.pad(jnp.asarray(v, jnp.float32).reshape(1, C),
                   ((0, 0), (0, Cp - C)))


def _choose_tile_batches(N, L, Cp):
    # ~10 live f32 (TM, Cp) slabs per tiled pass (double-buffered in/out blocks
    # plus the rolled/concatenated conv temporaries).
    row_bytes = 10 * Cp * 4
    max_rows = max(_TILE_VMEM_BUDGET // row_bytes, 1)
    tn = max(min(N, max_rows // L), 1)
    while tn > 1 and ((tn * L) % _SUBLANE != 0 or N % tn != 0):
        tn -= 1
    if (tn * L) % _SUBLANE != 0 or N % tn != 0:
        return None
    return tn


def resblock_forward(x, w1, w2, g1, b1, g2, b2, *, channels_last=False,
                     mxu_dtype=jnp.float32, force_tiled=False,
                     tile_batches=None):
    """ResBlock forward.  x: (N, C, L) like PyTorch Conv1d (or (N, L, C) if
    channels_last=True).  w*: (C_out, C_in, 3).  Training-mode BatchNorm."""
    if channels_last:
        N, L, C = x.shape
        x_nlc = jnp.asarray(x, jnp.float32)
    else:
        N, C, L = x.shape
        # NOTE(perf): keep activations channels-last end-to-end upstream to
        # avoid this HBM-level NCL->NLC transpose (pure extra bytes moved for a
        # memory-bound op); the kernel itself is channels-last.
        x_nlc = jnp.transpose(jnp.asarray(x, jnp.float32), (0, 2, 1))

    Cp = max(_LANE, _round_up(C, _LANE))             # lane-dense channel axis
    M = N * L
    x2d = jnp.pad(x_nlc.reshape(M, C), ((0, 0), (0, Cp - C)))

    w1cat = _prep_weight(w1, C, Cp, mxu_dtype)
    w2cat = _prep_weight(w2, C, Cp, mxu_dtype)
    g1p, b1p = _pad_vec(g1, C, Cp), _pad_vec(b1, C, Cp)
    g2p, b2p = _pad_vec(g2, C, Cp), _pad_vec(b2, C, Cp)

    fused_bytes = 12 * M * Cp * 4                    # rough live-set estimate
    want_tiled = force_tiled or fused_bytes > _FUSED_VMEM_BUDGET
    tn = tile_batches if tile_batches is not None else _choose_tile_batches(
        N, L, Cp)
    can_tile = (tn is not None and 0 < tn < N and N % tn == 0
                and (tn * L) % _SUBLANE == 0)

    if want_tiled and can_tile:
        out2d = _resblock_tiled(x2d, w1cat, w2cat, g1p, b1p, g2p, b2p,
                                L=L, tn=tn, Cp=Cp, mxu_dtype=mxu_dtype)
    else:
        # TODO(synk): very long single sequences (small N, huge L) would need an
        # additional tiling along L with a halo exchange; not implemented here.
        out2d = _resblock_fused(x2d, w1cat, w2cat, g1p, b1p, g2p, b2p,
                                L=L, mxu_dtype=mxu_dtype)

    out_nlc = out2d[:, :C].reshape(N, L, C)
    return out_nlc if channels_last else jnp.transpose(out_nlc, (0, 2, 1))


# ----------------------------------------------------------------------------
# Pure-JAX reference mirroring the PyTorch forward (training-mode BN).
# ----------------------------------------------------------------------------
def resblock_reference(x, w1, w2, g1, b1, g2, b2):
    def conv(y, w):
        return lax.conv_general_dilated(
            y, w, window_strides=(1,), padding=[(1, 1)],
            dimension_numbers=("NCH", "OIH", "NCH"))

    def bn(y, g, b):
        mean = jnp.mean(y, axis=(0, 2), keepdims=True)
        var = jnp.mean((y - mean) ** 2, axis=(0, 2), keepdims=True)
        return ((y - mean) * lax.rsqrt(var + EPS) * g.reshape(1, -1, 1)
                + b.reshape(1, -1, 1))

    h = jax.nn.relu(bn(conv(x, w1), g1, b1))
    h = bn(conv(h, w2), g2, b2)
    return jax.nn.relu(h + x)


if __name__ == "__main__":
    N, C, L, K = 2, 4, 16, 3

    key = jax.random.PRNGKey(0)
    kx, kw1, kw2 = jax.random.split(key, 3)

    x = jax.random.normal(kx, (N, C, L), dtype=jnp.float32)

    # kaiming_normal_(nonlinearity='relu'): std = sqrt(2 / fan_in), fan_in = C*K
    std = (2.0 / (C * K)) ** 0.5
    w1 = std * jax.random.normal(kw1, (C, C, K), dtype=jnp.float32)
    w2 = std * jax.random.normal(kw2, (C, C, K), dtype=jnp.float32)

    # BatchNorm1d default affine init: weight = 1, bias = 0.
    g1 = jnp.ones((C,), jnp.float32)
    b1 = jnp.zeros((C,), jnp.float32)
    g2 = jnp.ones((C,), jnp.float32)
    b2 = jnp.zeros((C,), jnp.float32)

    ref = resblock_reference(x, w1, w2, g1, b1, g2, b2)

    # 1) Fused single-block path (default at small sizes), f32 MXU operands.
    out = jax.block_until_ready(resblock_forward(x, w1, w2, g1, b1, g2, b2))
    assert out.shape == (N, C, L)
    assert jnp.allclose(out, ref, atol=1e-4, rtol=1e-4), "fused path mismatch"

    # 2) Batch-tiled three-pass pipeline (what large sizes use), f32 MXU.
    out_t = jax.block_until_ready(
        resblock_forward(x, w1, w2, g1, b1, g2, b2,
                         force_tiled=True, tile_batches=1))
    assert jnp.allclose(out_t, ref, atol=1e-4, rtol=1e-4), "tiled path mismatch"

    # 3) bf16 MXU operands (v6e/v7x fast path); BN/elementwise stays f32.
    out_bf = jax.block_until_ready(
        resblock_forward(x, w1, w2, g1, b1, g2, b2, mxu_dtype=jnp.bfloat16))
    assert jnp.allclose(out_bf, ref, atol=1e-1, rtol=1e-1), "bf16 path mismatch"

    print("KERNEL_OK")
</pallas_src>

<mosaic_0001>
module attributes {stable_mosaic.version = 11 : i64} {
  func.func @_resblock_fused_kernel(%arg0: memref<32x128xf32, #tpu.memory_space<vmem>>, %arg1: memref<384x128xf32, #tpu.memory_space<vmem>>, %arg2: memref<384x128xf32, #tpu.memory_space<vmem>>, %arg3: memref<1x128xf32, #tpu.memory_space<vmem>>, %arg4: memref<1x128xf32, #tpu.memory_space<vmem>>, %arg5: memref<1x128xf32, #tpu.memory_space<vmem>>, %arg6: memref<1x128xf32, #tpu.memory_space<vmem>>, %arg7: memref<32x128xf32, #tpu.memory_space<vmem>>) attributes {dimension_semantics = [], scalar_prefetch = 0 : i64, scratch_operands = 0 : i64, tpu.core_type = #tpu.core_type<tc>} {
    %c0 = arith.constant 0 : index
    %c0_0 = arith.constant 0 : index
    %0 = vector.load %arg0[%c0, %c0_0] : memref<32x128xf32, #tpu.memory_space<vmem>>, vector<32x128xf32>
    %1 = tpu.iota {dimensions = array<i32: 0>} : vector<32x1xi32>
    %c16_i32 = arith.constant 16 : i32
    %c0_i32 = arith.constant 0 : i32
    %2 = arith.cmpi eq, %c16_i32, %c0_i32 : i32
    %c1_i32 = arith.constant 1 : i32
    %3 = arith.select %2, %c1_i32, %c16_i32 : i32
    %4 = vector.broadcast %3 : i32 to vector<32x1xi32>
    %5 = arith.remsi %1, %4 : vector<32x1xi32>
    %c0_i32_1 = arith.constant 0 : i32
    %6 = vector.broadcast %c0_i32_1 : i32 to vector<32x1xi32>
    %7 = arith.cmpi ne, %5, %6 : vector<32x1xi32>
    %c0_i32_2 = arith.constant 0 : i32
    %8 = vector.broadcast %c0_i32_2 : i32 to vector<32x1xi32>
    %9 = arith.cmpi slt, %5, %8 : vector<32x1xi32>
    %c0_i32_3 = arith.constant 0 : i32
    %10 = arith.cmpi slt, %3, %c0_i32_3 : i32
    %11 = vector.broadcast %10 : i1 to vector<32x1xi1>
    %12 = vector.broadcast %11 : vector<32x1xi1> to vector<32x1xi1>
    %13 = arith.xori %9, %12 : vector<32x1xi1>
    %14 = arith.andi %13, %7 : vector<32x1xi1>
    %15 = vector.broadcast %3 : i32 to vector<32x1xi32>
    %16 = arith.addi %5, %15 : vector<32x1xi32>
    %17 = arith.select %14, %16, %5 : vector<32x1xi1>, vector<32x1xi32>
    %c0_i32_4 = arith.constant 0 : i32
    %18 = vector.broadcast %c0_i32_4 : i32 to vector<32x1xi32>
    %19 = arith.cmpi ne, %17, %18 : vector<32x1xi32>
    %20 = arith.extui %19 : vector<32x1xi1> to vector<32x1xi32>
    %21 = arith.sitofp %20 : vector<32x1xi32> to vector<32x1xf32>
    %c15_i32 = arith.constant 15 : i32
    %22 = vector.broadcast %c15_i32 : i32 to vector<32x1xi32>
    %23 = arith.cmpi ne, %17, %22 : vector<32x1xi32>
    %24 = arith.extui %23 : vector<32x1xi1> to vector<32x1xi32>
    %25 = arith.sitofp %24 : vector<32x1xi32> to vector<32x1xf32>
    %c0_5 = arith.constant 0 : index
    %c0_6 = arith.constant 0 : index
    %26 = vector.load %arg1[%c0_5, %c0_6] : memref<384x128xf32, #tpu.memory_space<vmem>>, vector<384x128xf32>
    %c1_i32_7 = arith.constant 1 : i32
    %27 = tpu.dynamic_rotate %0 by %c1_i32_7 dim 0 : vector<32x128xf32>, i32 -> vector<32x128xf32>
    %28 = vector.broadcast %21 : vector<32x1xf32> to vector<32x128xf32>
    %29 = arith.mulf %27, %28 : vector<32x128xf32>
    %c31_i32 = arith.constant 31 : i32
    %30 = tpu.dynamic_rotate %0 by %c31_i32 dim 0 : vector<32x128xf32>, i32 -> vector<32x128xf32>
    %31 = vector.broadcast %25 : vector<32x1xf32> to vector<32x128xf32>
    %32 = arith.mulf %30, %31 : vector<32x128xf32>
    %33 = tpu.concatenate %29, %0, %32 in 1 : vector<32x128xf32>, vector<32x128xf32>, vector<32x128xf32> -> vector<32x384xf32>
    %cst = arith.constant dense<0.000000e+00> : vector<32x128xf32>
    %34 = tpu.matmul %33, %26, %cst {dimension_numbers = #tpu.dot_dimension_numbers<[1], [0], [0], [1], [0, 0, 1, 1], [], []>} : vector<32x384xf32>, vector<384x128xf32>, vector<32x128xf32> -> vector<32x128xf32>
    %cst_8 = arith.constant dense<0.000000e+00> : vector<128xf32>
    %35 = vector.multi_reduction <add>, %34, %cst_8 [0] : vector<32x128xf32> to vector<128xf32>
    %36 = vector.shape_cast %35 : vector<128xf32> to vector<1x128xf32>
    %37 = arith.mulf %34, %34 : vector<32x128xf32>
    %cst_9 = arith.constant dense<0.000000e+00> : vector<128xf32>
    %38 = vector.multi_reduction <add>, %37, %cst_9 [0] : vector<32x128xf32> to vector<128xf32>
    %39 = vector.shape_cast %38 : vector<128xf32> to vector<1x128xf32>
    %cst_10 = arith.constant 3.125000e-02 : f32
    %40 = vector.broadcast %cst_10 : f32 to vector<1x128xf32>
    %41 = arith.mulf %36, %40 : vector<1x128xf32>
    %cst_11 = arith.constant 3.125000e-02 : f32
    %42 = vector.broadcast %cst_11 : f32 to vector<1x128xf32>
    %43 = arith.mulf %39, %42 : vector<1x128xf32>
    %44 = arith.mulf %41, %41 : vector<1x128xf32>
    %45 = arith.subf %43, %44 : vector<1x128xf32>
    %cst_12 = arith.constant 0.000000e+00 : f32
    %46 = vector.broadcast %cst_12 : f32 to vector<1x128xf32>
    %47 = arith.maximumf %45, %46 : vector<1x128xf32>
    %48 = vector.broadcast %41 : vector<1x128xf32> to vector<32x128xf32>
    %49 = arith.subf %34, %48 : vector<32x128xf32>
    %cst_13 = arith.constant 9.99999974E-6 : f32
    %50 = vector.broadcast %cst_13 : f32 to vector<1x128xf32>
    %51 = arith.addf %47, %50 : vector<1x128xf32>
    %52 = math.rsqrt %51 : vector<1x128xf32>
    %53 = vector.broadcast %52 : vector<1x128xf32> to vector<32x128xf32>
    %54 = arith.mulf %49, %53 : vector<32x128xf32>
    %c0_14 = arith.constant 0 : index
    %c0_15 = arith.constant 0 : index
    %55 = vector.load %arg3[%c0_14, %c0_15] : memref<1x128xf32, #tpu.memory_space<vmem>>, vector<1x128xf32>
    %56 = vector.broadcast %55 : vector<1x128xf32> to vector<32x128xf32>
    %57 = arith.mulf %54, %56 : vector<32x128xf32>
    %c0_16 = arith.constant 0 : index
    %c0_17 = arith.constant 0 : index
    %58 = vector.load %arg4[%c0_16, %c0_17] : memref<1x128xf32, #tpu.memory_space<vmem>>, vector<1x128xf32>
    %59 = vector.broadcast %58 : vector<1x128xf32> to vector<32x128xf32>
    %60 = arith.addf %57, %59 : vector<32x128xf32>
    %cst_18 = arith.constant 0.000000e+00 : f32
    %61 = vector.broadcast %cst_18 : f32 to vector<32x128xf32>
    %62 = arith.maximumf %60, %61 : vector<32x128xf32>
    %c0_19 = arith.constant 0 : index
    %c0_20 = arith.constant 0 : index
    %63 = vector.load %arg2[%c0_19, %c0_20] : memref<384x128xf32, #tpu.memory_space<vmem>>, vector<384x128xf32>
    %c1_i32_21 = arith.constant 1 : i32
    %64 = tpu.dynamic_rotate %62 by %c1_i32_21 dim 0 : vector<32x128xf32>, i32 -> vector<32x128xf32>
    %65 = vector.broadcast %21 : vector<32x1xf32> to vector<32x128xf32>
    %66 = arith.mulf %64, %65 : vector<32x128xf32>
    %c31_i32_22 = arith.constant 31 : i32
    %67 = tpu.dynamic_rotate %62 by %c31_i32_22 dim 0 : vector<32x128xf32>, i32 -> vector<32x128xf32>
    %68 = vector.broadcast %25 : vector<32x1xf32> to vector<32x128xf32>
    %69 = arith.mulf %67, %68 : vector<32x128xf32>
    %70 = tpu.concatenate %66, %62, %69 in 1 : vector<32x128xf32>, vector<32x128xf32>, vector<32x128xf32> -> vector<32x384xf32>
    %cst_23 = arith.constant dense<0.000000e+00> : vector<32x128xf32>
    %71 = tpu.matmul %70, %63, %cst_23 {dimension_numbers = #tpu.dot_dimension_numbers<[1], [0], [0], [1], [0, 0, 1, 1], [], []>} : vector<32x384xf32>, vector<384x128xf32>, vector<32x128xf32> -> vector<32x128xf32>
    %cst_24 = arith.constant dense<0.000000e+00> : vector<128xf32>
    %72 = vector.multi_reduction <add>, %71, %cst_24 [0] : vector<32x128xf32> to vector<128xf32>
    %73 = vector.shape_cast %72 : vector<128xf32> to vector<1x128xf32>
    %74 = arith.mulf %71, %71 : vector<32x128xf32>
    %cst_25 = arith.constant dense<0.000000e+00> : vector<128xf32>
    %75 = vector.multi_reduction <add>, %74, %cst_25 [0] : vector<32x128xf32> to vector<128xf32>
    %76 = vector.shape_cast %75 : vector<128xf32> to vector<1x128xf32>
    %cst_26 = arith.constant 3.125000e-02 : f32
    %77 = vector.broadcast %cst_26 : f32 to vector<1x128xf32>
    %78 = arith.mulf %73, %77 : vector<1x128xf32>
    %cst_27 = arith.constant 3.125000e-02 : f32
    %79 = vector.broadcast %cst_27 : f32 to vector<1x128xf32>
    %80 = arith.mulf %76, %79 : vector<1x128xf32>
    %81 = arith.mulf %78, %78 : vector<1x128xf32>
    %82 = arith.subf %80, %81 : vector<1x128xf32>
    %cst_28 = arith.constant 0.000000e+00 : f32
    %83 = vector.broadcast %cst_28 : f32 to vector<1x128xf32>
    %84 = arith.maximumf %82, %83 : vector<1x128xf32>
    %85 = vector.broadcast %78 : vector<1x128xf32> to vector<32x128xf32>
    %86 = arith.subf %71, %85 : vector<32x128xf32>
    %cst_29 = arith.constant 9.99999974E-6 : f32
    %87 = vector.broadcast %cst_29 : f32 to vector<1x128xf32>
    %88 = arith.addf %84, %87 : vector<1x128xf32>
    %89 = math.rsqrt %88 : vector<1x128xf32>
    %90 = vector.broadcast %89 : vector<1x128xf32> to vector<32x128xf32>
    %91 = arith.mulf %86, %90 : vector<32x128xf32>
    %c0_30 = arith.constant 0 : index
    %c0_31 = arith.constant 0 : index
    %92 = vector.load %arg5[%c0_30, %c0_31] : memref<1x128xf32, #tpu.memory_space<vmem>>, vector<1x128xf32>
    %93 = vector.broadcast %92 : vector<1x128xf32> to vector<32x128xf32>
    %94 = arith.mulf %91, %93 : vector<32x128xf32>
    %c0_32 = arith.constant 0 : index
    %c0_33 = arith.constant 0 : index
    %95 = vector.load %arg6[%c0_32, %c0_33] : memref<1x128xf32, #tpu.memory_space<vmem>>, vector<1x128xf32>
    %96 = vector.broadcast %95 : vector<1x128xf32> to vector<32x128xf32>
    %97 = arith.addf %94, %96 : vector<32x128xf32>
    %98 = arith.addf %97, %0 : vector<32x128xf32>
    %cst_34 = arith.constant 0.000000e+00 : f32
    %99 = vector.broadcast %cst_34 : f32 to vector<32x128xf32>
    %100 = arith.maximumf %98, %99 : vector<32x128xf32>
    %c0_35 = arith.constant 0 : index
    %c0_36 = arith.constant 0 : index
    %101 = vector.load %arg7[%c0_35, %c0_36] : memref<32x128xf32, #tpu.memory_space<vmem>>, vector<32x128xf32>
    tpu.vector_store %arg7[%c0_35, %c0_36], %100 {strides = array<i32>} : memref<32x128xf32, #tpu.memory_space<vmem>>, vector<32x128xf32>,
    return
  }
}

</mosaic_0001>

<bundles_post_ra>
// kernel: tpu_custom_call.1
= control target key start
LH: loop header
LB: loop body
LE: loop exit
PB: predicated region body
PF: predicated region fallthrough
CT: control target
= control target key end

     0   :  { %12 = vsyncpa [#allocation3], 0  ;;  %s1279_s0 = inlined_call_operand.hbm [shape: f32[32,128], index: 0, kind: input, shape index: {}]   ;;  %s1280_s1 = inlined_call_operand.hbm [shape: f32[384,128], index: 1, kind: input, shape index: {}]   ;;  %s1281_s2 = inlined_call_operand.hbm [shape: f32[384,128], index: 2, kind: input, shape index: {}]   ;;  %s1282_s3 = inlined_call_operand.vmem [shape: f32[1,128], index: 3, kind: input, shape index: {}]   ;;  %s1283_s4 = inlined_call_operand.vmem [shape: f32[1,128], index: 4, kind: input, shape index: {}]   ;;  %s1284_s5 = inlined_call_operand.vmem [shape: f32[1,128], index: 5, kind: input, shape index: {}]   ;;  %s1285_s6 = inlined_call_operand.vmem [shape: f32[1,128], index: 6, kind: input, shape index: {}]   ;;  %s1286_s7 = inlined_call_operand.hbm [shape: f32[32,128], index: 7, kind: output, shape index: {}]  }
   0x1   :  { %13 = vsyncpa [#allocation6], 0 }
   0x2   :  { %14 = vsyncpa [#allocation4], 0  ;;  %s1096_s24 = smov [#allocation5]   ;;  %s1097_s26 = smov [#allocation2]  }
   0x3   :  { %s32_s25 = sshll.u32 %s1096_s24, 4  ;;  %s20_s27 = sshll.u32 %s1097_s26, 4  ;;  %s33_s25 = int_to_ptr.vmem [resolvable:$true] %s32_s25  ;;  %s21_s27 = int_to_ptr.vmem [resolvable:$true] %s20_s27 }
   0x4   :  { %s1018_s28 = scalar_lea.vmem %s33_s25, 6144  ;;  %p1023_p1 = scmp.lt.s32.totalorder %s33_s25, %s33_s25 }
   0x5   :  { %p1019_p0 = scmp.ne.s32.totalorder %s33_s25, %s1018_s28  ;;  %p1024_p2 = scmp.lt.s32.totalorder %s1018_s28, %s1018_s28 }
   0x7   :  { %p1025_p3 = por %p1024_p2, %p1023_p1 }
   0x9   :  { %p1026_p4 = pnand %p1025_p3, %p1019_p0 }
   0xb   :  { %1029 = shalt.err (!%p1026_p4)
}
   0xc   :  { %s1098_s29 = smov 128   ;;  %s1099_s30 = smov 8  }
   0xd   :  { %38 = dma.hbm_to_vmem [thread:$0]  %s1280_s1, 6144, %s33_s25, [#allocation6], %s1098_s29, %s1098_s29, %s1099_s30  }
   0xe   :  { %s1038_s10 = scalar_lea.vmem %s21_s27, 512  ;;  %p1043_p6 = scmp.lt.s32.totalorder %s21_s27, %s21_s27 }
   0xf   :  { %p1039_p5 = scmp.ne.s32.totalorder %s21_s27, %s1038_s10  ;;  %p1044_p7 = scmp.lt.s32.totalorder %s1038_s10, %s1038_s10 }
  0x11   :  { %p1045_p8 = por %p1044_p7, %p1043_p6 }
  0x13   :  { %p1046_p9 = pnand %p1045_p8, %p1039_p5 }
  0x15   :  { %1049 = shalt.err (!%p1046_p9)
}
  0x16   :  { %26 = dma.hbm_to_vmem [thread:$0]  %s1279_s0, 512, %s21_s27, [#allocation3], %s1098_s29, %s1098_s29, %s1099_s30  }
  0x17   :  { %s1100_s13 = smov [#allocation7]  }
  0x18   :  { %s44_s14 = sshll.u32 %s1100_s13, 4  ;;  %s45_s14 = int_to_ptr.vmem [resolvable:$true] %s44_s14 }
  0x19   :  { %s1058_s15 = scalar_lea.vmem %s45_s14, 6144  ;;  %p1063_p11 = scmp.lt.s32.totalorder %s45_s14, %s45_s14 }
  0x1a   :  { %p1059_p10 = scmp.ne.s32.totalorder %s45_s14, %s1058_s15  ;;  %p1064_p12 = scmp.lt.s32.totalorder %s1058_s15, %s1058_s15 }
  0x1c   :  { %p1065_p13 = por %p1064_p12, %p1063_p11 }
  0x1e   :  { %p1066_p0 = pnand %p1065_p13, %p1059_p10 }
  0x20   :  { %1069 = shalt.err (!%p1066_p0)
}
  0x21   :  { %50 = dma.hbm_to_vmem [thread:$0]  %s1281_s2, 6144, %s45_s14, [#allocation6], %s1098_s29, %s1098_s29, %s1099_s30  }
  0x22   :  { %1090 = dma.done.wait [#allocation3], 512  }
  0x23   :  { %1091 = vsyncadd [#allocation3], 4294966784 }
  0x24   :  { %1092 = dma.done.wait [#allocation6], 12288  }
  0x25   :  { %1093 = vsyncadd [#allocation6], 4294955008  ;;  %v180_v0 = vld [vmem:[#allocation5 + $0xf8] sm:$0xff]  ;;  %v179_v2 = vld [vmem:[#allocation5 + $0xf0] sm:$0xff]  ;;  %v72_v18 = vlaneseq  ;;  %v1101_v61 = vmov 0.0   ;;  %s1102_s21 = smov [#allocation8]  }
  0x26   :  { %v164_v1 = vld [vmem:[#allocation5 + $0x78] sm:$0xff]  ;;  %795 = vmatprep.subr.mxu0 %v180_v0  ;;  %v163_v4 = vld [vmem:[#allocation5 + $0x70] sm:$0xff]  ;;  %v178_v5 = vld [vmem:[#allocation5 + $0xe8] sm:$0xff]  ;;  %s774_s22 = sshll.u32 %s1102_s21, 4  ;;  %s775_s22 = int_to_ptr.vmem [resolvable:$true] %s774_s22 }
  0x27   :  { %v196_v3 = vld [vmem:[#allocation5 + $0x178] sm:$0xff]  ;;  %796 = vmatpush3.msra.mxu0 %v164_v1  ;;  %v195_v6 = vld [vmem:[#allocation5 + $0x170] sm:$0xff]  ;;  %v162_v7 = vld [vmem:[#allocation5 + $0x68] sm:$0xff]  ;;  %v1161_v25 = vshrl.u32 %v72_v18, 7  ;;  %p1075_p2 = scmp.lt.s32.totalorder %s775_s22, %s775_s22 }
  0x28   :  { %923 = vmatprep.subr.mxu1 %v196_v3  ;;  %797 = vmatprep.subr.mxu0 %v179_v2  ;;  %v194_v8 = vld [vmem:[#allocation5 + $0x168] sm:$0xff]  ;;  %v177_v9 = vld [vmem:[#allocation5 + $0xe0] sm:$0xff]  ;;  %v176_v12 = vld [vmem:[#allocation5 + $0xd8] sm:$0xff] }
  0x29   :  { %924 = vmatpush3.msra.mxu1 %v196_v3  ;;  %798 = vmatpush3.msra.mxu0 %v163_v4  ;;  %v161_v10 = vld [vmem:[#allocation5 + $0x60] sm:$0xff]  ;;  %v160_v13 = vld [vmem:[#allocation5 + $0x58] sm:$0xff]  ;;  %v175_v15 = vld [vmem:[#allocation5 + $0xd0] sm:$0xff]  ;;  %v74_v32 = vadd.s32 8, %v1161_v25  ;;  %v81_v38 = vand.u32 15, %v1161_v25  ;;  %v76_v45 = vadd.s32 24, %v1161_v25 }
  0x2a   :  { %925 = vmatprep.subr.mxu1 %v195_v6  ;;  %799 = vmatprep.subr.mxu0 %v178_v5  ;;  %v193_v11 = vld [vmem:[#allocation5 + $0x160] sm:$0xff]  ;;  %v192_v14 = vld [vmem:[#allocation5 + $0x158] sm:$0xff]  ;;  %v159_v16 = vld [vmem:[#allocation5 + $0x50] sm:$0xff]  ;;  %vm201_vm1 = vcmp.lt.s32.totalorder %v1161_v25, 1  ;;  %v75_v52 = vadd.s32 16, %v1161_v25  ;;  %vm214_vm2 = vcmp.lt.s32.totalorder %v1161_v25, 7 }
  0x2b   :  { %926 = vmatpush3.msra.mxu1 %v195_v6  ;;  %800 = vmatpush3.msra.mxu0 %v162_v7  ;;  %v191_v17 = vld [vmem:[#allocation5 + $0x150] sm:$0xff]  ;;  %v174_v19 = vld [vmem:[#allocation5 + $0xc8] sm:$0xff]  ;;  %v173_v22 = vld [vmem:[#allocation5 + $0xc0] sm:$0xff]  ;;  %v88_v44 = vand.u32 15, %v74_v32  ;;  %vm1176_vm0 = vcmp.ne.s32.totalorder %v81_v38, 0  ;;  %v102_v59 = vand.u32 15, %v76_v45 }
  0x2c   :  { %927 = vmatprep.subr.mxu1 %v194_v8  ;;  %801 = vmatprep.subr.mxu0 %v177_v9  ;;  %v158_v20 = vld [vmem:[#allocation5 + $0x48] sm:$0xff]  ;;  %v157_v23 = vld [vmem:[#allocation5 + $0x40] sm:$0xff]  ;;  %v172_v26 = vld [vmem:[#allocation5 + $0xb8] sm:$0xff]  ;;  %v1191_v62 = vsel %vm1176_vm0, 1.0, %v1101_v61  ;;  %v95_v3 = vand.u32 15, %v75_v52 }
  0x2d   :  { %928 = vmatpush3.msra.mxu1 %v194_v8  ;;  %802 = vmatpush3.msra.mxu0 %v161_v10  ;;  %v190_v21 = vld [vmem:[#allocation5 + $0x148] sm:$0xff]  ;;  %v189_v24 = vld [vmem:[#allocation5 + $0x140] sm:$0xff]  ;;  %v156_v27 = vld [vmem:[#allocation5 + $0x38] sm:$0xff]  ;;  %vm1185_vm3 = vcmp.ne.s32.totalorder %v88_v44, 15  ;;  %vm140_vm4 = vcmp.ne.s32.totalorder %v102_v59, 15 }
  0x2e   :  { %929 = vmatprep.subr.mxu1 %v193_v11  ;;  %803 = vmatprep.subr.mxu0 %v176_v12  ;;  %v188_v28 = vld [vmem:[#allocation5 + $0x138] sm:$0xff]  ;;  %v171_v29 = vld [vmem:[#allocation5 + $0xb0] sm:$0xff]  ;;  %v170_v33 = vld [vmem:[#allocation5 + $0xa8] sm:$0xff]  ;;  %v1202_v5 = vsel %vm1185_vm3, 1.0, %v1101_v61  ;;  %vm127_vm5 = vcmp.ne.s32.totalorder %v95_v3, 0 }
  0x2f   :  { %930 = vmatpush3.msra.mxu1 %v193_v11  ;;  %804 = vmatpush3.msra.mxu0 %v160_v13  ;;  %v155_v30 = vld [vmem:[#allocation5 + $0x30] sm:$0xff]  ;;  %v154_v34 = vld [vmem:[#allocation5 + $0x28] sm:$0xff]  ;;  %v1164_v36 = vld [vmem:[#allocation2] sm:$0xff] }
  0x30   :  { %931 = vmatprep.subr.mxu1 %v192_v14  ;;  %805 = vmatprep.subr.mxu0 %v175_v15  ;;  %v187_v31 = vld [vmem:[#allocation5 + $0x130] sm:$0xff]  ;;  %v186_v35 = vld [vmem:[#allocation5 + $0x128] sm:$0xff]  ;;  %v1166_v37 = vld [vmem:[#allocation2 + $0x18] sm:$0xff]  ;;  %v197_v47 = vrot.slane %v1164_v36, 7  ;;  %v210_v2 = vrot.slane %v1164_v36, 1  ;;  %v1214_v15 = vsel %vm140_vm4, 1.0, %v1101_v61 }
  0x31   :  { %932 = vmatpush3.msra.mxu1 %v192_v14  ;;  %806 = vmatpush3.msra.mxu0 %v159_v16  ;;  %v169_v39 = vld [vmem:[#allocation5 + $0xa0] sm:$0xff]  ;;  %v1169_v42 = vld [vmem:[#allocation2 + $0x8] sm:$0xff]  ;;  %v1171_v43 = vld [vmem:[#allocation2 + $0x10] sm:$0xff]  ;;  %v200_v48 = vrot.slane %v1166_v37, 7  ;;  %v213_v7 = vrot.slane %v1166_v37, 1 }
  0x32   :  { %933 = vmatprep.subr.mxu1 %v191_v17  ;;  %807 = vmatprep.subr.mxu0 %v174_v19  ;;  %v153_v40 = vld [vmem:[#allocation5 + $0x20] sm:$0xff]  ;;  %v168_v46 = vld [vmem:[#allocation5 + $0x98] sm:$0xff]  ;;  %v167_v53 = vld [vmem:[#allocation5 + $0x90] sm:$0xff]  ;;  %v211_v54 = vrot.slane %v1169_v42, 1  ;;  %v212_v55 = vrot.slane %v1171_v43, 1  ;;  %v198_v11 = vrot.slane %v1169_v42, 7 }
  0x33   :  { %934 = vmatpush3.msra.mxu1 %v191_v17  ;;  %808 = vmatpush3.msra.mxu0 %v158_v20  ;;  %v185_v41 = vld [vmem:[#allocation5 + $0x120] sm:$0xff]  ;;  %v152_v49 = vld [vmem:[#allocation5 + $0x18] sm:$0xff]  ;;  %v151_v56 = vld [vmem:[#allocation5 + $0x10] sm:$0xff]  ;;  %v205_v63 = vsel %vm201_vm1, %v200_v48, %v197_v47  ;;  %v199_v12 = vrot.slane %v1171_v43, 7  ;;  %v218_v16 = vsel %vm214_vm2, %v213_v7, %v210_v2  ;;  %v1224_v19 = vsel %vm127_vm5, 1.0, %v1101_v61 }
  0x34   :  { %935 = vmatprep.subr.mxu1 %v190_v21  ;;  %809 = vmatprep.subr.mxu0 %v173_v22  ;;  %v184_v50 = vld [vmem:[#allocation5 + $0x118] sm:$0xff]  ;;  %v183_v57 = vld [vmem:[#allocation5 + $0x110] sm:$0xff]  ;;  %v166_v60 = vld [vmem:[#allocation5 + $0x88] sm:$0xff]  ;;  %v216_v6 = vsel %vm214_vm2, %v211_v54, %v212_v55  ;;  %v206_v9 = vmul.f32 %v1191_v62, %v205_v63  ;;  %v217_v13 = vsel %vm214_vm2, %v210_v2, %v211_v54 }
  0x35   :  { %936 = vmatpush3.msra.mxu1 %v190_v21  ;;  %810 = vmatpush3.msra.mxu0 %v157_v23  ;;  %v150_v0 = vld [vmem:[#allocation5 + $0x8] sm:$0xff]  ;;  %v165_v4 = vld [vmem:[#allocation5 + $0x80] sm:$0xff]  ;;  %v220_v14 = vmul.f32 %v1202_v5, %v216_v6  ;;  %v215_v17 = vsel %vm214_vm2, %v212_v55, %v213_v7  ;;  %v204_v18 = vsel %vm201_vm1, %v197_v47, %v198_v11  ;;  %v482_v44 = vld [vmem:[#allocation7 + $0xd0] sm:$0xff] }
  0x36   :  { %937 = vmatprep.subr.mxu1 %v189_v24  ;;  %811 = vmatprep.subr.mxu0 %v172_v26  ;;  %v182_v1 = vld [vmem:[#allocation5 + $0x108] sm:$0xff]  ;;  %v149_v8 = vld [vmem:[#allocation5] sm:$0xff]  ;;  %v203_v20 = vsel %vm201_vm1, %v198_v11, %v199_v12  ;;  %v222_v21 = vmul.f32 %v1214_v15, %v218_v16  ;;  %v202_v23 = vsel %vm201_vm1, %v199_v12, %v200_v48  ;;  %v503_v26 = vld [vmem:[#allocation7 + $0x178] sm:$0xff] }
  0x37   :  { %938 = vmatpush3.msra.mxu1 %v189_v24  ;;  %812 = vmatpush3.msra.mxu0 %v156_v27  ;;  %v181_v10 = vld [vmem:[#allocation5 + $0x100] sm:$0xff]  ;;  %v208_v22 = vmul.f32 %v1224_v19, %v203_v20  ;;  %v487_v24 = vld [vmem:[#allocation7 + $0xf8] sm:$0xff]  ;;  %v501_v32 = vld [vmem:[#allocation7 + $0x168] sm:$0xff] }
  0x38   :  { %939 = vmatprep.subr.mxu1 %v188_v28  ;;  %813 = vmatprep.subr.mxu0 %v171_v29  ;;  %v471_v27 = vld [vmem:[#allocation7 + $0x78] sm:$0xff]  ;;  %v502_v29 = vld [vmem:[#allocation7 + $0x170] sm:$0xff]  ;;  %v468_v38 = vld [vmem:[#allocation7 + $0x60] sm:$0xff] }
  0x39   :  { %940 = vmatpush3.msra.mxu1 %v188_v28  ;;  %814 = vmatpush3.msra.mxu0 %v155_v30  ;;  %v486_v28 = vld [vmem:[#allocation7 + $0xf0] sm:$0xff]  ;;  %v481_v47 = vld [vmem:[#allocation7 + $0xc8] sm:$0xff]  ;;  %v496_v51 = vld [vmem:[#allocation7 + $0x140] sm:$0xff] }
  0x3a   :  { %941 = vmatprep.subr.mxu1 %v187_v31  ;;  %815 = vmatprep.subr.mxu0 %v170_v33  ;;  %v470_v30 = vld [vmem:[#allocation7 + $0x70] sm:$0xff]  ;;  %v469_v33 = vld [vmem:[#allocation7 + $0x68] sm:$0xff]  ;;  %v464_v52 = vld [vmem:[#allocation7 + $0x40] sm:$0xff] }
  0x3b   :  { %942 = vmatpush3.msra.mxu1 %v187_v31  ;;  %816 = vmatpush3.msra.mxu0 %v154_v34  ;;  %v485_v31 = vld [vmem:[#allocation7 + $0xe8] sm:$0xff]  ;;  %v484_v34 = vld [vmem:[#allocation7 + $0xe0] sm:$0xff]  ;;  %v498_v45 = vld [vmem:[#allocation7 + $0x150] sm:$0xff] }
  0x3c   :  { %943 = vmatprep.subr.mxu1 %v186_v35  ;;  %817 = vmatprep.subr.mxu0 %v169_v39  ;;  %v483_v39 = vld [vmem:[#allocation7 + $0xd8] sm:$0xff]  ;;  %v497_v48 = vld [vmem:[#allocation7 + $0x148] sm:$0xff]  ;;  %v462_v58 = vld [vmem:[#allocation7 + $0x30] sm:$0xff] }
  0x3d   :  { %944 = vmatpush3.msra.mxu1 %v186_v35  ;;  %818 = vmatpush3.msra.mxu0 %v153_v40  ;;  %v500_v35 = vld [vmem:[#allocation7 + $0x160] sm:$0xff]  ;;  %v499_v40 = vld [vmem:[#allocation7 + $0x158] sm:$0xff]  ;;  %v477_v59 = vld [vmem:[#allocation7 + $0xa8] sm:$0xff] }
  0x3e   :  { %945 = vmatprep.subr.mxu1 %v185_v41  ;;  %819 = vmatprep.subr.mxu0 %v168_v46  ;;  %v466_v46 = vld [vmem:[#allocation7 + $0x50] sm:$0xff]  ;;  %v495_v54 = vld [vmem:[#allocation7 + $0x138] sm:$0xff]  ;;  %v461_v61 = vld [vmem:[#allocation7 + $0x28] sm:$0xff] }
  0x3f   :  { %946 = vmatpush3.msra.mxu1 %v185_v41  ;;  %820 = vmatpush3.msra.mxu0 %v152_v49  ;;  %v467_v41 = vld [vmem:[#allocation7 + $0x58] sm:$0xff]  ;;  %v465_v49 = vld [vmem:[#allocation7 + $0x48] sm:$0xff]  ;;  %v476_v63 = vld [vmem:[#allocation7 + $0xa0] sm:$0xff] }
  0x40   :  { %947 = vmatprep.subr.mxu1 %v184_v50  ;;  %821 = vmatprep.subr.mxu0 %v167_v53  ;;  %v479_v53 = vld [vmem:[#allocation7 + $0xb8] sm:$0xff]  ;;  %v474_v6 = vld [vmem:[#allocation7 + $0x90] sm:$0xff]  ;;  %v457_v11 = vld [vmem:[#allocation7 + $0x8] sm:$0xff] }
  0x41   :  { %948 = vmatpush3.msra.mxu1 %v184_v50  ;;  %822 = vmatpush3.msra.mxu0 %v151_v56  ;;  %v480_v50 = vld [vmem:[#allocation7 + $0xc0] sm:$0xff]  ;;  %v463_v55 = vld [vmem:[#allocation7 + $0x38] sm:$0xff]  ;;  %v478_v56 = vld [vmem:[#allocation7 + $0xb0] sm:$0xff] }
  0x42   :  { %949 = vmatprep.subr.mxu1 %v183_v57  ;;  %823 = vmatprep.subr.mxu0 %v166_v60  ;;  %v493_v60 = vld [vmem:[#allocation7 + $0x128] sm:$0xff]  ;;  %v475_v2 = vld [vmem:[#allocation7 + $0x98] sm:$0xff]  ;;  %v490_v7 = vld [vmem:[#allocation7 + $0x110] sm:$0xff] }
  0x43   :  { %950 = vmatpush3.msra.mxu1 %v183_v57  ;;  %824 = vmatpush3.msra.mxu0 %v150_v0  ;;  %v494_v57 = vld [vmem:[#allocation7 + $0x130] sm:$0xff]  ;;  %v492_v0 = vld [vmem:[#allocation7 + $0x120] sm:$0xff]  ;;  %v491_v3 = vld [vmem:[#allocation7 + $0x118] sm:$0xff] }
  0x44   :  { %951 = vmatprep.subr.mxu1 %v182_v1  ;;  %825 = vmatprep.subr.mxu0 %v165_v4  ;;  %v459_v4 = vld [vmem:[#allocation7 + $0x18] sm:$0xff]  ;;  %v472_v12 = vld [vmem:[#allocation7 + $0x80] sm:$0xff] }
  0x45   :  { %287 = vmatprep.mubr.f32.mxu0 %v1164_v36  ;;  %826 = vmatpush3.msra.mxu0 %v149_v8  ;;  %v458_v8 = vld [vmem:[#allocation7 + $0x10] sm:$0xff] }
  0x46   :  { %952 = vmatpush3.msra.mxu1 %v182_v1  ;;  %288 = vmatmul.mubr.f32.vlgmr.msra.gmra.mxu0 %v206_v9  ;;  %v460_v1 = vld [vmem:[#allocation7 + $0x20] sm:$0xff]  ;;  %v473_v9 = vld [vmem:[#allocation7 + $0x88] sm:$0xff] }
  0x47   :  { %953 = vmatprep.subr.mxu1 %v181_v10  ;;  %955 = vmatprep.mubr.f32.mxu1 %v217_v13  ;;  %v488_v13 = vld [vmem:[#allocation7 + $0x100] sm:$0xff] }
  0x48   :  { %954 = vmatpush3.msra.mxu1 %v181_v10  ;;  %292 = vmatprep.mubr.f32.mxu0 %v1169_v42  ;;  %v489_v10 = vld [vmem:[#allocation7 + $0x108] sm:$0xff] }
  0x49   :  { %956 = vmatmul.mubr.f32.vlgmr.msra.gmra.mxu1 %v220_v14  ;;  %859 = vmatprep.subr.mxu0 %v487_v24  ;;  %v456_v14 = vld [vmem:[#allocation7] sm:$0xff] }
  0x4a   :  { %958 = vmatprep.mubr.f32.mxu1 %v215_v17  ;;  %293 = vmatmul.mubr.f32.gmra.mxu0 %v204_v18 }
  0x4b   :  { %297 = vmatprep.mubr.f32.mxu0 %v1171_v43  ;;  %961 = vmatprep.subr.mxu1 %v503_v26 }
  0x4c   :  { %860 = vmatpush3.msra.mxu0 %v471_v27  ;;  %962 = vmatpush3.msra.mxu1 %v503_v26 }
  0x4d   :  { %959 = vmatmul.mubr.f32.gmra.mxu1 %v222_v21  ;;  %861 = vmatprep.subr.mxu0 %v486_v28 }
  0x4e   :  { %298 = vmatmul.mubr.f32.gmra.mxu0 %v208_v22  ;;  %963 = vmatprep.subr.mxu1 %v502_v29 }
  0x4f   :  { %302 = vmatprep.mubr.f32.mxu0 %v1166_v37  ;;  %862 = vmatpush3.msra.mxu0 %v470_v30 }
  0x50   :  { %964 = vmatpush3.msra.mxu1 %v502_v29  ;;  %863 = vmatprep.subr.mxu0 %v485_v31 }
  0x51   :  { %965 = vmatprep.subr.mxu1 %v501_v32  ;;  %864 = vmatpush3.msra.mxu0 %v469_v33 }
  0x52   :  { %303 = vmatmul.mubr.f32.gmra.mxu0 %v202_v23  ;;  %966 = vmatpush3.msra.mxu1 %v501_v32 }
  0x53   :  { %865 = vmatprep.subr.mxu0 %v484_v34  ;;  %967 = vmatprep.subr.mxu1 %v500_v35 }
  0x54   :  { %866 = vmatpush3.msra.mxu0 %v468_v38  ;;  %968 = vmatpush3.msra.mxu1 %v500_v35 }
  0x55   :  { %867 = vmatprep.subr.mxu0 %v483_v39  ;;  %969 = vmatprep.subr.mxu1 %v499_v40 }
  0x56   :  { %868 = vmatpush3.msra.mxu0 %v467_v41  ;;  %970 = vmatpush3.msra.mxu1 %v499_v40 }
  0x57   :  { %869 = vmatprep.subr.mxu0 %v482_v44  ;;  %971 = vmatprep.subr.mxu1 %v498_v45 }
  0x58   :  { %870 = vmatpush3.msra.mxu0 %v466_v46  ;;  %972 = vmatpush3.msra.mxu1 %v498_v45 }
  0x59   :  { %871 = vmatprep.subr.mxu0 %v481_v47  ;;  %973 = vmatprep.subr.mxu1 %v497_v48 }
  0x5a   :  { %872 = vmatpush3.msra.mxu0 %v465_v49  ;;  %974 = vmatpush3.msra.mxu1 %v497_v48 }
  0x5b   :  { %873 = vmatprep.subr.mxu0 %v480_v50  ;;  %975 = vmatprep.subr.mxu1 %v496_v51 }
  0x5c   :  { %874 = vmatpush3.msra.mxu0 %v464_v52  ;;  %976 = vmatpush3.msra.mxu1 %v496_v51 }
  0x5d   :  { %875 = vmatprep.subr.mxu0 %v479_v53  ;;  %977 = vmatprep.subr.mxu1 %v495_v54 }
  0x5e   :  { %876 = vmatpush3.msra.mxu0 %v463_v55  ;;  %978 = vmatpush3.msra.mxu1 %v495_v54 }
  0x5f   :  { %877 = vmatprep.subr.mxu0 %v478_v56  ;;  %979 = vmatprep.subr.mxu1 %v494_v57 }
  0x60   :  { %878 = vmatpush3.msra.mxu0 %v462_v58  ;;  %980 = vmatpush3.msra.mxu1 %v494_v57 }
  0x61   :  { %879 = vmatprep.subr.mxu0 %v477_v59  ;;  %981 = vmatprep.subr.mxu1 %v493_v60 }
  0x62   :  { %880 = vmatpush3.msra.mxu0 %v461_v61  ;;  %982 = vmatpush3.msra.mxu1 %v493_v60 }
  0x63   :  { %881 = vmatprep.subr.mxu0 %v476_v63  ;;  %983 = vmatprep.subr.mxu1 %v492_v0 }
  0x64   :  { %882 = vmatpush3.msra.mxu0 %v460_v1  ;;  %984 = vmatpush3.msra.mxu1 %v492_v0 }
  0x65   :  { %883 = vmatprep.subr.mxu0 %v475_v2  ;;  %985 = vmatprep.subr.mxu1 %v491_v3 }
  0x66   :  { %884 = vmatpush3.msra.mxu0 %v459_v4  ;;  %986 = vmatpush3.msra.mxu1 %v491_v3 }
  0x67   :  { %885 = vmatprep.subr.mxu0 %v474_v6  ;;  %987 = vmatprep.subr.mxu1 %v490_v7 }
  0x68   :  { %886 = vmatpush3.msra.mxu0 %v458_v8  ;;  %988 = vmatpush3.msra.mxu1 %v490_v7 }
  0x69   :  { %887 = vmatprep.subr.mxu0 %v473_v9  ;;  %989 = vmatprep.subr.mxu1 %v489_v10 }
  0x6a   :  { %888 = vmatpush3.msra.mxu0 %v457_v11  ;;  %990 = vmatpush3.msra.mxu1 %v489_v10 }
  0x6b   :  { %889 = vmatprep.subr.mxu0 %v472_v12  ;;  %991 = vmatprep.subr.mxu1 %v488_v13 }
  0x6c   :  { %890 = vmatpush3.msra.mxu0 %v456_v14  ;;  %992 = vmatpush3.msra.mxu1 %v488_v13  ;;  %v791_v13 = vld [vmem:[%s1282_s3] ss:$0 sm:$0xff] }
 0x106   :  { %v827_v16 = vpop.f32.mrf.mxu0 }
 0x108   :  { %v828_v17 = vpop.f32.mrf.mxu0 }
 0x109   :  { %v957_v18 = vpop.f32.mrf.mxu1  ;;  %v829_v24 = vadd.f32 %v828_v17, %v827_v16 }
 0x10a   :  { %v830_v20 = vpop.f32.mrf.mxu0 }
 0x10b   :  { %v374_v21 = vpop.f32.mrf.mxu1 }
 0x10c   :  { %v831_v22 = vpop.f32.mrf.mxu0  ;;  %v375_v31 = vadd.f32 %v829_v24, %v374_v21 }
 0x10d   :  { %v960_v23 = vpop.f32.mrf.mxu1  ;;  %v832_v26 = vadd.f32 %v831_v22, %v830_v20  ;;  %v792_v20 = vld [vmem:[%s1283_s4] ss:$0 sm:$0xff] }
 0x10e   :  { %v833_v27 = vpop.f32.mrf.mxu0  ;;  %v402_v39 = vmul.f32 %v375_v31, %v375_v31 }
 0x10f   :  { %v380_v28 = vadd.f32 %v957_v18, %v832_v26  ;;  %v384_v30 = vpop.f32.mrf.mxu1 }
 0x110   :  { %v834_v29 = vpop.f32.mrf.mxu0 }
 0x111   :  { %v835_v32 = vadd.f32 %v834_v29, %v833_v27  ;;  %v403_v34 = vmul.f32 %v380_v28, %v380_v28  ;;  %v393_v40 = vadd.f32 %v380_v28, %v375_v31 }
 0x112   :  { %v836_v33 = vpop.f32.mrf.mxu0 }
 0x113   :  { %v385_v35 = vadd.f32 %v835_v32, %v384_v30  ;;  %v406_v46 = vadd.f32 %v403_v34, %v402_v39 }
 0x114   :  { %v837_v38 = vpop.f32.mrf.mxu0 }
 0x115   :  { %v404_v41 = vmul.f32 %v385_v35, %v385_v35  ;;  %v838_v44 = vadd.f32 %v837_v38, %v836_v33  ;;  %v394_v45 = vadd.f32 %v393_v40, %v385_v35 }
 0x117   :  { %v390_v47 = vadd.f32 %v960_v23, %v838_v44  ;;  %v407_v48 = vadd.f32 %v406_v46, %v404_v41 }
 0x119   :  { %v395_v49 = vadd.f32 %v394_v45, %v390_v47  ;;  %v405_v50 = vmul.f32 %v390_v47, %v390_v47 }
 0x11b   :  { %v396_v51 = vrot.slane %v395_v49, 4  ;;  %v408_v52 = vadd.f32 %v407_v48, %v405_v50 }
 0x11d   :  { %v397_v53 = vadd.f32 %v396_v51, %v395_v49  ;;  %v409_v54 = vrot.slane %v408_v52, 4 }
 0x11f   :  { %v398_v55 = vrot.slane %v397_v53, 2  ;;  %v410_v56 = vadd.f32 %v409_v54, %v408_v52 }
 0x121   :  { %v399_v57 = vadd.f32 %v398_v55, %v397_v53  ;;  %v411_v58 = vrot.slane %v410_v56, 2 }
 0x123   :  { %v400_v59 = vrot.slane %v399_v57, 1  ;;  %v412_v60 = vadd.f32 %v411_v58, %v410_v56 }
 0x125   :  { %v401_v61 = vadd.f32 %v400_v59, %v399_v57  ;;  %v413_v63 = vrot.slane %v412_v60, 1 }
 0x127   :  { %v414_v0 = vadd.f32 %v413_v63, %v412_v60  ;;  %v415_v1 = vmul.f32 0.03125, %v401_v61 }
 0x129   :  { %v416_v2 = vmul.f32 0.03125, %v414_v0  ;;  %v417_v3 = vmul.f32 %v415_v1, %v415_v1  ;;  %v423_v8 = vsub.f32 %v390_v47, %v415_v1  ;;  %v420_v9 = vsub.f32 %v375_v31, %v415_v1 }
 0x12a   :  { %v422_v10 = vsub.f32 %v385_v35, %v415_v1  ;;  %v421_v11 = vsub.f32 %v380_v28, %v415_v1 }
 0x12b   :  { %v418_v4 = vsub.f32 %v416_v2, %v417_v3 }
 0x12d   :  { %v419_v6 = vmax.f32 %v418_v4, 0.0 }
 0x12f   :  { %v424_v7 = vadd.f32 1e-05, %v419_v6 }
 0x131   :  { %1006 = vrsqrt.f32 %v424_v7 }
 0x13e   :  { %v1007_v12 = vpop.eup %1006 }
 0x13f   :  { %v429_v14 = vmul.f32 %v1007_v12, %v423_v8  ;;  %v426_v16 = vmul.f32 %v1007_v12, %v420_v9  ;;  %v428_v17 = vmul.f32 %v1007_v12, %v422_v10  ;;  %v427_v18 = vmul.f32 %v1007_v12, %v421_v11 }
 0x141   :  { %v437_v21 = vmul.f32 %v791_v13, %v426_v16  ;;  %v439_v22 = vmul.f32 %v791_v13, %v428_v17  ;;  %v440_v23 = vmul.f32 %v791_v13, %v429_v14  ;;  %v438_v24 = vmul.f32 %v791_v13, %v427_v18 }
 0x143   :  { %v448_v26 = vadd.f32 %v792_v20, %v437_v21  ;;  %v450_v27 = vadd.f32 %v792_v20, %v439_v22  ;;  %v451_v28 = vadd.f32 %v792_v20, %v440_v23  ;;  %v449_v29 = vadd.f32 %v792_v20, %v438_v24 }
 0x145   :  { %v452_v30 = vmax.f32 %v448_v26, 0.0  ;;  %v454_v31 = vmax.f32 %v450_v27, 0.0  ;;  %v455_v32 = vmax.f32 %v451_v28, 0.0  ;;  %v453_v33 = vmax.f32 %v449_v29, 0.0 }
 0x147   :  { %v504_v34 = vrot.slane %v452_v30, 7  ;;  %592 = vmatprep.mubr.f32.mxu0 %v452_v30  ;;  %v516_v35 = vrot.slane %v452_v30, 1  ;;  %v517_v38 = vrot.slane %v453_v33, 1  ;;  %v518_v39 = vrot.slane %v454_v31, 1 }
 0x148   :  { %v507_v40 = vrot.slane %v455_v32, 7  ;;  %v519_v41 = vrot.slane %v455_v32, 1  ;;  %v505_v51 = vrot.slane %v453_v33, 7  ;;  %v506_v52 = vrot.slane %v454_v31, 7 }
 0x149   :  { %v521_v44 = vsel %vm214_vm2, %v517_v38, %v518_v39  ;;  %v522_v45 = vsel %vm214_vm2, %v516_v35, %v517_v38 }
 0x14a   :  { %v525_v46 = vmul.f32 %v1202_v5, %v521_v44  ;;  %993 = vmatprep.mubr.f32.mxu1 %v522_v45  ;;  %v511_v47 = vsel %vm201_vm1, %v507_v40, %v504_v34  ;;  %v523_v49 = vsel %vm214_vm2, %v519_v41, %v516_v35  ;;  %v520_v50 = vsel %vm214_vm2, %v518_v39, %v519_v41 }
 0x14b   :  { %v512_v48 = vmul.f32 %v1191_v62, %v511_v47  ;;  %v527_v5 = vmul.f32 %v1214_v15, %v523_v49  ;;  %v510_v53 = vsel %vm201_vm1, %v504_v34, %v505_v51  ;;  %v509_v62 = vsel %vm201_vm1, %v505_v51, %v506_v52  ;;  %v793_v51 = vld [vmem:[%s1284_s5] ss:$0 sm:$0xff]  ;;  %s1070_s5 = scalar_lea.vmem %s775_s22, 512 }
 0x14c   :  { %994 = vmatmul.mubr.f32.vlgmr.msra.gmra.mxu1 %v525_v46  ;;  %v514_v54 = vmul.f32 %v1224_v19, %v509_v62  ;;  %v508_v55 = vsel %vm201_vm1, %v506_v52, %v507_v40  ;;  %p1071_p1 = scmp.ne.s32.totalorder %s775_s22, %s1070_s5  ;;  %p1076_p3 = scmp.lt.s32.totalorder %s1070_s5, %s1070_s5 }
 0x14d   :  { %593 = vmatmul.mubr.f32.vlgmr.msra.gmra.mxu0 %v512_v48  ;;  %996 = vmatprep.mubr.f32.mxu1 %v520_v50 }
 0x14e   :  { %597 = vmatprep.mubr.f32.mxu0 %v453_v33  ;;  %p1077_p4 = por %p1076_p3, %p1075_p2 }
 0x150   :  { %997 = vmatmul.mubr.f32.gmra.mxu1 %v527_v5  ;;  %p1078_p5 = pnand %p1077_p4, %p1071_p1 }
 0x151   :  { %598 = vmatmul.mubr.f32.gmra.mxu0 %v510_v53 }
 0x152   :  { %602 = vmatprep.mubr.f32.mxu0 %v454_v31 }
 0x155   :  { %603 = vmatmul.mubr.f32.gmra.mxu0 %v514_v54  ;;  %v794_v54 = vld [vmem:[%s1285_s6] ss:$0 sm:$0xff] }
 0x156   :  { %607 = vmatprep.mubr.f32.mxu0 %v455_v32 }
 0x159   :  { %608 = vmatmul.mubr.f32.gmra.mxu0 %v508_v55 }
 0x20c   :  { %v995_v57 = vpop.f32.mrf.mxu1 }
 0x20d   :  { %v891_v56 = vpop.f32.mrf.mxu0 }
 0x20e   :  { %v679_v58 = vpop.f32.mrf.mxu1 }
 0x20f   :  { %v892_v15 = vpop.f32.mrf.mxu0 }
 0x210   :  { %v893_v61 = vadd.f32 %v892_v15, %v891_v56  ;;  %v998_v0 = vpop.f32.mrf.mxu1 }
 0x211   :  { %v894_v59 = vpop.f32.mrf.mxu0 }
 0x212   :  { %v680_v4 = vadd.f32 %v893_v61, %v679_v58  ;;  %v689_v6 = vpop.f32.mrf.mxu1 }
 0x213   :  { %v895_v60 = vpop.f32.mrf.mxu0 }
 0x214   :  { %v896_v63 = vadd.f32 %v895_v60, %v894_v59  ;;  %v707_v10 = vmul.f32 %v680_v4, %v680_v4 }
 0x215   :  { %v897_v1 = vpop.f32.mrf.mxu0 }
 0x216   :  { %v685_v2 = vadd.f32 %v995_v57, %v896_v63 }
 0x217   :  { %v898_v3 = vpop.f32.mrf.mxu0 }
 0x218   :  { %v899_v19 = vadd.f32 %v898_v3, %v897_v1  ;;  %v708_v8 = vmul.f32 %v685_v2, %v685_v2  ;;  %v698_v11 = vadd.f32 %v685_v2, %v680_v4 }
 0x219   :  { %v900_v7 = vpop.f32.mrf.mxu0 }
 0x21a   :  { %v690_v25 = vadd.f32 %v899_v19, %v689_v6  ;;  %v711_v14 = vadd.f32 %v708_v8, %v707_v10 }
 0x21b   :  { %v901_v9 = vpop.f32.mrf.mxu0 }
 0x21c   :  { %v709_v12 = vmul.f32 %v690_v25, %v690_v25  ;;  %v902_v13 = vadd.f32 %v901_v9, %v900_v7  ;;  %v699_v16 = vadd.f32 %v698_v11, %v690_v25 }
 0x21e   :  { %v695_v17 = vadd.f32 %v998_v0, %v902_v13  ;;  %v712_v18 = vadd.f32 %v711_v14, %v709_v12 }
 0x220   :  { %v700_v20 = vadd.f32 %v699_v16, %v695_v17  ;;  %v710_v21 = vmul.f32 %v695_v17, %v695_v17 }
 0x222   :  { %v701_v22 = vrot.slane %v700_v20, 4  ;;  %v713_v23 = vadd.f32 %v712_v18, %v710_v21 }
 0x224   :  { %v702_v24 = vadd.f32 %v701_v22, %v700_v20  ;;  %v714_v26 = vrot.slane %v713_v23, 4 }
 0x226   :  { %v703_v27 = vrot.slane %v702_v24, 2  ;;  %v715_v28 = vadd.f32 %v714_v26, %v713_v23 }
 0x228   :  { %v704_v29 = vadd.f32 %v703_v27, %v702_v24  ;;  %v716_v30 = vrot.slane %v715_v28, 2 }
 0x22a   :  { %v705_v31 = vrot.slane %v704_v29, 1  ;;  %v717_v32 = vadd.f32 %v716_v30, %v715_v28 }
 0x22c   :  { %v706_v33 = vadd.f32 %v705_v31, %v704_v29  ;;  %v718_v34 = vrot.slane %v717_v32, 1 }
 0x22e   :  { %v719_v35 = vadd.f32 %v718_v34, %v717_v32  ;;  %v720_v38 = vmul.f32 0.03125, %v706_v33 }
 0x230   :  { %v721_v39 = vmul.f32 0.03125, %v719_v35  ;;  %v722_v40 = vmul.f32 %v720_v38, %v720_v38  ;;  %v728_v46 = vsub.f32 %v695_v17, %v720_v38  ;;  %v725_v47 = vsub.f32 %v680_v4, %v720_v38 }
 0x231   :  { %v726_v48 = vsub.f32 %v685_v2, %v720_v38  ;;  %v727_v49 = vsub.f32 %v690_v25, %v720_v38 }
 0x232   :  { %v723_v41 = vsub.f32 %v721_v39, %v722_v40 }
 0x234   :  { %v724_v44 = vmax.f32 %v723_v41, 0.0 }
 0x236   :  { %v729_v45 = vadd.f32 1e-05, %v724_v44 }
 0x238   :  { %1008 = vrsqrt.f32 %v729_v45 }
 0x245   :  { %v1009_v50 = vpop.eup %1008 }
 0x246   :  { %v734_v52 = vmul.f32 %v1009_v50, %v728_v46  ;;  %v731_v5 = vmul.f32 %v1009_v50, %v725_v47  ;;  %v732_v53 = vmul.f32 %v1009_v50, %v726_v48  ;;  %v733_v62 = vmul.f32 %v1009_v50, %v727_v49 }
 0x248   :  { %v745_v55 = vmul.f32 %v793_v51, %v734_v52  ;;  %v742_v56 = vmul.f32 %v793_v51, %v731_v5  ;;  %v743_v57 = vmul.f32 %v793_v51, %v732_v53  ;;  %v744_v15 = vmul.f32 %v793_v51, %v733_v62 }
 0x24a   :  { %v753_v58 = vadd.f32 %v794_v54, %v742_v56  ;;  %v754_v59 = vadd.f32 %v794_v54, %v743_v57  ;;  %v755_v60 = vadd.f32 %v794_v54, %v744_v15  ;;  %v756_v61 = vadd.f32 %v794_v54, %v745_v55 }
 0x24c   :  { %v757_v63 = vadd.f32 %v753_v58, %v1164_v36  ;;  %v758_v0 = vadd.f32 %v754_v59, %v1169_v42  ;;  %v759_v1 = vadd.f32 %v755_v60, %v1171_v43  ;;  %v760_v2 = vadd.f32 %v756_v61, %v1166_v37 }
 0x24e   :  { %v761_v3 = vmax.f32 %v757_v63, 0.0  ;;  %v762_v4 = vmax.f32 %v758_v0, 0.0  ;;  %v763_v19 = vmax.f32 %v759_v1, 0.0  ;;  %v764_v6 = vmax.f32 %v760_v2, 0.0 }
 0x250   :  { %765 = vst [vmem:[#allocation8] sm:$0xff] %v761_v3  ;;  %766 = vst [vmem:[#allocation8 + $0x8] sm:$0xff] %v762_v4 }
 0x251   :  { %767 = vst [vmem:[#allocation8 + $0x10] sm:$0xff] %v763_v19  ;;  %768 = vst [vmem:[#allocation8 + $0x18] sm:$0xff] %v764_v6 }
 0x252   :  { %1081 = shalt.err (!%p1078_p5)
}
 0x253   :  { %780 = dma.vmem_to_hbm [thread:$0]  %s775_s22, 512, %s1286_s7, [#allocation4], %s1098_s29, %s1098_s29, %s1099_s30  }
 0x254   :  { %1094 = dma.done.wait [#allocation4], 512  }
 0x255   :  { %1095 = vsyncadd [#allocation4], 4294966784 }
 0x256   :  { %784 = vsyncpa [#allocation3], 1 }
 0x257   :  { %785 = vsyncpa [#allocation6], 1 }
 0x258   :  { %786 = vsyncpa [#allocation4], 1 }

</bundles_post_ra>
